<compile_context>
chip_gen: v5e
topology: v5e:2x2
jax: 0.10.0
libtpu: 0.0.40
codegen_flags: <defaults>
</compile_context>

<pallas_src>
import math
import functools

import jax
import jax.numpy as jnp
import numpy as np
from jax import lax
from jax.experimental import pallas as pl
from jax.experimental.pallas import tpu as pltpu


# ---------------- fully fused MHA kernel (one batch per program) -------------
def _mha_fused_kernel(xq_ref, xk_ref, xvT_ref,
                      wq_ref, wk_ref, wvT_ref, w4_ref,
                      bq_ref, bk_ref, bv_ref, b4_ref,
                      o_ref, *, S, H, Dh, masked):
    """QKV projection + all-head attention + head-merge + output projection.

    One grid program handles one batch element; everything stays in vregs and
    a single lane-dense (S, D) result is stored per program.
    """
    D = H * Dh
    R = S // H          # merged rows contributed per head  (Dh*S // D)
    g = D // S          # head-dim columns packed per merged row
    f32 = jnp.float32
    inv_scale = f32(1.0 / math.sqrt(D))   # reference scales by sqrt(d_model)

    # --- projections: register-resident, no VMEM scratch round-trip ---
    q = jnp.dot(xq_ref[...], wq_ref[...], preferred_element_type=f32) + bq_ref[...]
    k = jnp.dot(xk_ref[...], wk_ref[...], preferred_element_type=f32) + bk_ref[...]
    # value projection produced directly in transposed (head_dim-major)
    # orientation: vT = Wv^T @ x^T + bv   -> (D, S)
    vT = jnp.dot(wvT_ref[...], xvT_ref[...], preferred_element_type=f32) + bv_ref[...]

    if masked:
        # Causal mask, built once (identical for every head).
        row = lax.broadcasted_iota(jnp.int32, (S, S), 0)
        col = lax.broadcasted_iota(jnp.int32, (S, S), 1)
        neg = jnp.where(col > row, f32(-1000000000.0), f32(0.0))

    # TODO(synk): for a self-attention fast path (query is key is value) the
    # three projections could be one (S, D) @ (D, 3D) MXU push.
    merged_rows = []
    for h in range(H):                       # H small & static -> unrolled
        qh = q[:, h * Dh:(h + 1) * Dh]       # (S, Dh)
        kh = k[:, h * Dh:(h + 1) * Dh]       # (S, Dh)
        vTh = vT[h * Dh:(h + 1) * Dh, :]     # (Dh, S)

        # scores = q @ k^T (contract head_dim), mask added BEFORE the scaling
        s = lax.dot_general(qh, kh, (((1,), (1,)), ((), ())),
                            preferred_element_type=f32)          # (S, S)
        if masked:
            s = s + neg
        s = s * inv_scale                    # /= sqrt(d_model), not sqrt(Dh)

        # softmax over keys, kept in f32 (v5e has no bf16 VPU/EUP)
        m = jnp.max(s, axis=-1, keepdims=True)
        p = jnp.exp(s - m)
        p = p * pl.reciprocal(jnp.sum(p, axis=-1, keepdims=True))  # exact

        # attention output directly transposed: (Dh, S_q) = v^T @ p^T
        xT = lax.dot_general(vTh, p, (((1,), (1,)), ((), ())),
                             preferred_element_type=f32)

        # head-merge (the PyTorch transpose(-1,-2).contiguous().view quirk):
        # merged row (h*R + j), lanes [l*S, (l+1)*S) = xT row (j*g + l).
        for j in range(R):
            merged_rows.append(jnp.concatenate(
                [xT[j * g + l:j * g + l + 1, :] for l in range(g)], axis=1))

    merged = jnp.concatenate(merged_rows, axis=0)   # (S, D), merged layout

    # fused output projection + single lane-dense store for this batch
    o_ref[...] = (jnp.dot(merged, w4_ref[...], preferred_element_type=f32)
                  + b4_ref[...])


# ---------------------------- full forward pass -------------------------------
@functools.partial(jax.jit, static_argnames=("n_heads", "mask"))
def multi_head_attention(query, key, value, params, *, n_heads, mask):
    B, S, D = query.shape
    Dh = D // n_heads
    assert D % n_heads == 0
    # In-kernel merged-layout construction requires these (see module TODO).
    assert S % n_heads == 0 and D % S == 0

    xq = query.reshape(B * S, D)
    xk = key.reshape(B * S, D)
    xvT = jnp.transpose(value, (0, 2, 1))       # (B, D, S): input layout plumbing
    wvT = params["wv"].T                        # PyTorch-native (out, in) layout

    kern = functools.partial(_mha_fused_kernel, S=S, H=n_heads, Dh=Dh,
                             masked=bool(mask))
    act_spec = pl.BlockSpec((S, D), lambda b: (b, 0))
    w_spec = pl.BlockSpec((D, D), lambda b: (0, 0))
    brow_spec = pl.BlockSpec((1, D), lambda b: (0, 0))
    bcol_spec = pl.BlockSpec((D, 1), lambda b: (0, 0))

    out = pl.pallas_call(
        kern,
        out_shape=jax.ShapeDtypeStruct((B * S, D), jnp.float32),
        grid=(B,),
        in_specs=[act_spec, act_spec,
                  pl.BlockSpec((None, D, S), lambda b: (b, 0, 0)),   # xvT
                  w_spec, w_spec, w_spec, w_spec,                    # wq wk wvT w4
                  brow_spec, brow_spec, bcol_spec, brow_spec],       # bq bk bv b4
        out_specs=act_spec,
        compiler_params=pltpu.CompilerParams(
            dimension_semantics=("parallel",)),                      # 2 TCs on v7x
    )(xq, xk, xvT,
      params["wq"], params["wk"], wvT, params["w4"],
      params["bq"].reshape(1, D), params["bk"].reshape(1, D),
      params["bv"].reshape(D, 1), params["b4"].reshape(1, D))

    return out.reshape(B, S, D)


# ----------------------------- pure-JAX reference -----------------------------
def reference(query, key, value, params, *, n_heads, mask):
    B, S, D = query.shape
    Dh = D // n_heads
    q = query @ params["wq"] + params["bq"]
    k = key @ params["wk"] + params["bk"]
    v = value @ params["wv"] + params["bv"]
    split = lambda x: jnp.transpose(x.reshape(B, S, n_heads, Dh), (0, 2, 1, 3))
    q, k, v = split(q), split(k), split(v)
    scores = jnp.einsum("bhqd,bhkd->bhqk", q, k)
    if mask:
        row = jnp.arange(S)[:, None]
        col = jnp.arange(S)[None, :]
        scores = scores + jnp.where(col > row, -1000000000.0, 0.0)
    scores = scores / math.sqrt(D)
    p = jax.nn.softmax(scores, axis=-1)
    x = jnp.einsum("bhqk,bhkd->bhqd", p, v)
    x = jnp.transpose(x, (0, 1, 3, 2)).reshape(B, -1, D)
    return x @ params["w4"] + params["b4"]


# ------------------------------------ main ------------------------------------
if __name__ == "__main__":
    B, S, D, H = 2, 8, 32, 4  # batch, seq, d_model, n_heads

    key0 = jax.random.PRNGKey(0)
    ks = jax.random.split(key0, 11)
    bound = 1.0 / math.sqrt(D)  # matches nn.Linear default init scale

    params = {
        "wq": jax.random.uniform(ks[0], (D, D), jnp.float32, -bound, bound),
        "bq": jax.random.uniform(ks[1], (D,), jnp.float32, -bound, bound),
        "wk": jax.random.uniform(ks[2], (D, D), jnp.float32, -bound, bound),
        "bk": jax.random.uniform(ks[3], (D,), jnp.float32, -bound, bound),
        "wv": jax.random.uniform(ks[4], (D, D), jnp.float32, -bound, bound),
        "bv": jax.random.uniform(ks[5], (D,), jnp.float32, -bound, bound),
        "w4": jax.random.uniform(ks[6], (D, D), jnp.float32, -bound, bound),
        "b4": jax.random.uniform(ks[7], (D,), jnp.float32, -bound, bound),
    }

    query = jax.random.normal(ks[8], (B, S, D), jnp.float32)
    key_in = jax.random.normal(ks[9], (B, S, D), jnp.float32)
    value = jax.random.normal(ks[10], (B, S, D), jnp.float32)

    for MASK in (True, False):
        out = multi_head_attention(query, key_in, value, params, n_heads=H, mask=MASK)
        out = jax.block_until_ready(out)
        ref = reference(query, key_in, value, params, n_heads=H, mask=MASK)
        assert out.shape == (B, S, D)
        np.testing.assert_allclose(np.asarray(out), np.asarray(ref),
                                   rtol=1e-5, atol=1e-5)

    print("KERNEL_OK")
</pallas_src>

<mosaic_0001>
module attributes {stable_mosaic.version = 11 : i64} {
  func.func @_mha_fused_kernel(%arg0: i32, %arg1: memref<8x32xf32, #tpu.memory_space<vmem>>, %arg2: memref<8x32xf32, #tpu.memory_space<vmem>>, %arg3: memref<1x32x8xf32, #tpu.memory_space<vmem>>, %arg4: memref<32x32xf32, #tpu.memory_space<vmem>>, %arg5: memref<32x32xf32, #tpu.memory_space<vmem>>, %arg6: memref<32x32xf32, #tpu.memory_space<vmem>>, %arg7: memref<32x32xf32, #tpu.memory_space<vmem>>, %arg8: memref<1x32xf32, #tpu.memory_space<vmem>>, %arg9: memref<1x32xf32, #tpu.memory_space<vmem>>, %arg10: memref<32x1xf32, #tpu.memory_space<vmem>>, %arg11: memref<1x32xf32, #tpu.memory_space<vmem>>, %arg12: memref<8x32xf32, #tpu.memory_space<vmem>>) attributes {dimension_semantics = [#tpu.dimension_semantics<parallel>], iteration_bounds = array<i64: 2>, scalar_prefetch = 0 : i64, scratch_operands = 0 : i64, tpu.core_type = #tpu.core_type<tc>, window_params = [{transform_indices = @transform_0, window_bounds = array<i64: 8, 32>}, {transform_indices = @transform_1, window_bounds = array<i64: 8, 32>}, {transform_indices = @transform_2, window_bounds = array<i64: 1, 32, 8>}, {pipeline_mode = #tpu.pipeline_mode<synchronous>, transform_indices = @transform_3, window_bounds = array<i64: 32, 32>}, {pipeline_mode = #tpu.pipeline_mode<synchronous>, transform_indices = @transform_4, window_bounds = array<i64: 32, 32>}, {pipeline_mode = #tpu.pipeline_mode<synchronous>, transform_indices = @transform_5, window_bounds = array<i64: 32, 32>}, {pipeline_mode = #tpu.pipeline_mode<synchronous>, transform_indices = @transform_6, window_bounds = array<i64: 32, 32>}, {pipeline_mode = #tpu.pipeline_mode<synchronous>, transform_indices = @transform_7, window_bounds = array<i64: 1, 32>}, {pipeline_mode = #tpu.pipeline_mode<synchronous>, transform_indices = @transform_8, window_bounds = array<i64: 1, 32>}, {pipeline_mode = #tpu.pipeline_mode<synchronous>, transform_indices = @transform_9, window_bounds = array<i64: 32, 1>}, {pipeline_mode = #tpu.pipeline_mode<synchronous>, transform_indices = @transform_10, window_bounds = array<i64: 1, 32>}, {transform_indices = @transform_11, window_bounds = array<i64: 8, 32>}]} {
    %c0 = arith.constant 0 : index
    %c0_0 = arith.constant 0 : index
    %0 = vector.load %arg1[%c0, %c0_0] : memref<8x32xf32, #tpu.memory_space<vmem>>, vector<8x32xf32>
    %c0_1 = arith.constant 0 : index
    %c0_2 = arith.constant 0 : index
    %1 = vector.load %arg4[%c0_1, %c0_2] : memref<32x32xf32, #tpu.memory_space<vmem>>, vector<32x32xf32>
    %cst = arith.constant dense<0.000000e+00> : vector<8x32xf32>
    %2 = tpu.matmul %0, %1, %cst {dimension_numbers = #tpu.dot_dimension_numbers<[1], [0], [0], [1], [0, 0, 1, 1], [], []>} : vector<8x32xf32>, vector<32x32xf32>, vector<8x32xf32> -> vector<8x32xf32>
    %c0_3 = arith.constant 0 : index
    %c0_4 = arith.constant 0 : index
    %3 = vector.load %arg8[%c0_3, %c0_4] : memref<1x32xf32, #tpu.memory_space<vmem>>, vector<1x32xf32>
    %4 = vector.broadcast %3 : vector<1x32xf32> to vector<8x32xf32>
    %5 = arith.addf %2, %4 : vector<8x32xf32>
    %c0_5 = arith.constant 0 : index
    %c0_6 = arith.constant 0 : index
    %6 = vector.load %arg2[%c0_5, %c0_6] : memref<8x32xf32, #tpu.memory_space<vmem>>, vector<8x32xf32>
    %c0_7 = arith.constant 0 : index
    %c0_8 = arith.constant 0 : index
    %7 = vector.load %arg5[%c0_7, %c0_8] : memref<32x32xf32, #tpu.memory_space<vmem>>, vector<32x32xf32>
    %cst_9 = arith.constant dense<0.000000e+00> : vector<8x32xf32>
    %8 = tpu.matmul %6, %7, %cst_9 {dimension_numbers = #tpu.dot_dimension_numbers<[1], [0], [0], [1], [0, 0, 1, 1], [], []>} : vector<8x32xf32>, vector<32x32xf32>, vector<8x32xf32> -> vector<8x32xf32>
    %c0_10 = arith.constant 0 : index
    %c0_11 = arith.constant 0 : index
    %9 = vector.load %arg9[%c0_10, %c0_11] : memref<1x32xf32, #tpu.memory_space<vmem>>, vector<1x32xf32>
    %10 = vector.broadcast %9 : vector<1x32xf32> to vector<8x32xf32>
    %11 = arith.addf %8, %10 : vector<8x32xf32>
    %c0_12 = arith.constant 0 : index
    %c0_13 = arith.constant 0 : index
    %12 = vector.load %arg6[%c0_12, %c0_13] : memref<32x32xf32, #tpu.memory_space<vmem>>, vector<32x32xf32>
    %c0_14 = arith.constant 0 : index
    %c0_15 = arith.constant 0 : index
    %c0_16 = arith.constant 0 : index
    %13 = vector.load %arg3[%c0_14, %c0_15, %c0_16] : memref<1x32x8xf32, #tpu.memory_space<vmem>>, vector<1x32x8xf32>
    %14 = vector.shape_cast %13 : vector<1x32x8xf32> to vector<32x8xf32>
    %cst_17 = arith.constant dense<0.000000e+00> : vector<32x8xf32>
    %15 = tpu.matmul %12, %14, %cst_17 {dimension_numbers = #tpu.dot_dimension_numbers<[1], [0], [0], [1], [0, 0, 1, 1], [], []>} : vector<32x32xf32>, vector<32x8xf32>, vector<32x8xf32> -> vector<32x8xf32>
    %c0_18 = arith.constant 0 : index
    %c0_19 = arith.constant 0 : index
    %16 = vector.load %arg10[%c0_18, %c0_19] : memref<32x1xf32, #tpu.memory_space<vmem>>, vector<32x1xf32>
    %17 = vector.broadcast %16 : vector<32x1xf32> to vector<32x8xf32>
    %18 = arith.addf %15, %17 : vector<32x8xf32>
    %19 = tpu.iota {dimensions = array<i32: 0>} : vector<8x8xi32>
    %20 = tpu.iota {dimensions = array<i32: 1>} : vector<8x8xi32>
    %21 = arith.cmpi sgt, %20, %19 : vector<8x8xi32>
    %cst_20 = arith.constant -1.000000e+09 : f32
    %cst_21 = arith.constant 0.000000e+00 : f32
    %22 = vector.broadcast %cst_20 : f32 to vector<8x8xf32>
    %23 = vector.broadcast %cst_21 : f32 to vector<8x8xf32>
    %24 = arith.select %21, %22, %23 : vector<8x8xi1>, vector<8x8xf32>
    %25 = vector.extract_strided_slice %5 {offsets = [0, 0], sizes = [8, 8], strides = [1, 1]} : vector<8x32xf32> to vector<8x8xf32>
    %26 = vector.extract_strided_slice %11 {offsets = [0, 0], sizes = [8, 8], strides = [1, 1]} : vector<8x32xf32> to vector<8x8xf32>
    %27 = vector.extract_strided_slice %18 {offsets = [0, 0], sizes = [8, 8], strides = [1, 1]} : vector<32x8xf32> to vector<8x8xf32>
    %cst_22 = arith.constant dense<0.000000e+00> : vector<8x8xf32>
    %28 = tpu.matmul %25, %26, %cst_22 {dimension_numbers = #tpu.dot_dimension_numbers<[1], [1], [0], [0], [0, 0, 1, 0], [], []>} : vector<8x8xf32>, vector<8x8xf32>, vector<8x8xf32> -> vector<8x8xf32>
    %29 = arith.addf %28, %24 : vector<8x8xf32>
    %cst_23 = arith.constant 0.176776692 : f32
    %30 = vector.broadcast %cst_23 : f32 to vector<8x8xf32>
    %31 = arith.mulf %29, %30 : vector<8x8xf32>
    %cst_24 = arith.constant dense<0xFF800000> : vector<8xf32>
    %32 = vector.multi_reduction <maximumf>, %31, %cst_24 [1] : vector<8x8xf32> to vector<8xf32>
    %33 = vector.shape_cast %32 : vector<8xf32> to vector<8x1xf32>
    %34 = vector.broadcast %33 : vector<8x1xf32> to vector<8x8xf32>
    %35 = arith.subf %31, %34 : vector<8x8xf32>
    %36 = math.exp %35 : vector<8x8xf32>
    %cst_25 = arith.constant dense<0.000000e+00> : vector<8xf32>
    %37 = vector.multi_reduction <add>, %36, %cst_25 [1] : vector<8x8xf32> to vector<8xf32>
    %38 = vector.shape_cast %37 : vector<8xf32> to vector<8x1xf32>
    %39 = tpu.reciprocal %38 : vector<8x1xf32> -> vector<8x1xf32>
    %40 = vector.broadcast %39 : vector<8x1xf32> to vector<8x8xf32>
    %41 = arith.mulf %36, %40 : vector<8x8xf32>
    %cst_26 = arith.constant dense<0.000000e+00> : vector<8x8xf32>
    %42 = tpu.matmul %27, %41, %cst_26 {dimension_numbers = #tpu.dot_dimension_numbers<[1], [1], [0], [0], [0, 0, 1, 0], [], []>} : vector<8x8xf32>, vector<8x8xf32>, vector<8x8xf32> -> vector<8x8xf32>
    %43 = vector.extract_strided_slice %42 {offsets = [0, 0], sizes = [1, 8], strides = [1, 1]} : vector<8x8xf32> to vector<1x8xf32>
    %44 = vector.extract_strided_slice %42 {offsets = [1, 0], sizes = [1, 8], strides = [1, 1]} : vector<8x8xf32> to vector<1x8xf32>
    %45 = vector.extract_strided_slice %42 {offsets = [2, 0], sizes = [1, 8], strides = [1, 1]} : vector<8x8xf32> to vector<1x8xf32>
    %46 = vector.extract_strided_slice %42 {offsets = [3, 0], sizes = [1, 8], strides = [1, 1]} : vector<8x8xf32> to vector<1x8xf32>
    %47 = tpu.concatenate %43, %44, %45, %46 in 1 : vector<1x8xf32>, vector<1x8xf32>, vector<1x8xf32>, vector<1x8xf32> -> vector<1x32xf32>
    %48 = vector.extract_strided_slice %42 {offsets = [4, 0], sizes = [1, 8], strides = [1, 1]} : vector<8x8xf32> to vector<1x8xf32>
    %49 = vector.extract_strided_slice %42 {offsets = [5, 0], sizes = [1, 8], strides = [1, 1]} : vector<8x8xf32> to vector<1x8xf32>
    %50 = vector.extract_strided_slice %42 {offsets = [6, 0], sizes = [1, 8], strides = [1, 1]} : vector<8x8xf32> to vector<1x8xf32>
    %51 = vector.extract_strided_slice %42 {offsets = [7, 0], sizes = [1, 8], strides = [1, 1]} : vector<8x8xf32> to vector<1x8xf32>
    %52 = tpu.concatenate %48, %49, %50, %51 in 1 : vector<1x8xf32>, vector<1x8xf32>, vector<1x8xf32>, vector<1x8xf32> -> vector<1x32xf32>
    %53 = vector.extract_strided_slice %5 {offsets = [0, 8], sizes = [8, 8], strides = [1, 1]} : vector<8x32xf32> to vector<8x8xf32>
    %54 = vector.extract_strided_slice %11 {offsets = [0, 8], sizes = [8, 8], strides = [1, 1]} : vector<8x32xf32> to vector<8x8xf32>
    %55 = vector.extract_strided_slice %18 {offsets = [8, 0], sizes = [8, 8], strides = [1, 1]} : vector<32x8xf32> to vector<8x8xf32>
    %cst_27 = arith.constant dense<0.000000e+00> : vector<8x8xf32>
    %56 = tpu.matmul %53, %54, %cst_27 {dimension_numbers = #tpu.dot_dimension_numbers<[1], [1], [0], [0], [0, 0, 1, 0], [], []>} : vector<8x8xf32>, vector<8x8xf32>, vector<8x8xf32> -> vector<8x8xf32>
    %57 = arith.addf %56, %24 : vector<8x8xf32>
    %cst_28 = arith.constant 0.176776692 : f32
    %58 = vector.broadcast %cst_28 : f32 to vector<8x8xf32>
    %59 = arith.mulf %57, %58 : vector<8x8xf32>
    %cst_29 = arith.constant dense<0xFF800000> : vector<8xf32>
    %60 = vector.multi_reduction <maximumf>, %59, %cst_29 [1] : vector<8x8xf32> to vector<8xf32>
    %61 = vector.shape_cast %60 : vector<8xf32> to vector<8x1xf32>
    %62 = vector.broadcast %61 : vector<8x1xf32> to vector<8x8xf32>
    %63 = arith.subf %59, %62 : vector<8x8xf32>
    %64 = math.exp %63 : vector<8x8xf32>
    %cst_30 = arith.constant dense<0.000000e+00> : vector<8xf32>
    %65 = vector.multi_reduction <add>, %64, %cst_30 [1] : vector<8x8xf32> to vector<8xf32>
    %66 = vector.shape_cast %65 : vector<8xf32> to vector<8x1xf32>
    %67 = tpu.reciprocal %66 : vector<8x1xf32> -> vector<8x1xf32>
    %68 = vector.broadcast %67 : vector<8x1xf32> to vector<8x8xf32>
    %69 = arith.mulf %64, %68 : vector<8x8xf32>
    %cst_31 = arith.constant dense<0.000000e+00> : vector<8x8xf32>
    %70 = tpu.matmul %55, %69, %cst_31 {dimension_numbers = #tpu.dot_dimension_numbers<[1], [1], [0], [0], [0, 0, 1, 0], [], []>} : vector<8x8xf32>, vector<8x8xf32>, vector<8x8xf32> -> vector<8x8xf32>
    %71 = vector.extract_strided_slice %70 {offsets = [0, 0], sizes = [1, 8], strides = [1, 1]} : vector<8x8xf32> to vector<1x8xf32>
    %72 = vector.extract_strided_slice %70 {offsets = [1, 0], sizes = [1, 8], strides = [1, 1]} : vector<8x8xf32> to vector<1x8xf32>
    %73 = vector.extract_strided_slice %70 {offsets = [2, 0], sizes = [1, 8], strides = [1, 1]} : vector<8x8xf32> to vector<1x8xf32>
    %74 = vector.extract_strided_slice %70 {offsets = [3, 0], sizes = [1, 8], strides = [1, 1]} : vector<8x8xf32> to vector<1x8xf32>
    %75 = tpu.concatenate %71, %72, %73, %74 in 1 : vector<1x8xf32>, vector<1x8xf32>, vector<1x8xf32>, vector<1x8xf32> -> vector<1x32xf32>
    %76 = vector.extract_strided_slice %70 {offsets = [4, 0], sizes = [1, 8], strides = [1, 1]} : vector<8x8xf32> to vector<1x8xf32>
    %77 = vector.extract_strided_slice %70 {offsets = [5, 0], sizes = [1, 8], strides = [1, 1]} : vector<8x8xf32> to vector<1x8xf32>
    %78 = vector.extract_strided_slice %70 {offsets = [6, 0], sizes = [1, 8], strides = [1, 1]} : vector<8x8xf32> to vector<1x8xf32>
    %79 = vector.extract_strided_slice %70 {offsets = [7, 0], sizes = [1, 8], strides = [1, 1]} : vector<8x8xf32> to vector<1x8xf32>
    %80 = tpu.concatenate %76, %77, %78, %79 in 1 : vector<1x8xf32>, vector<1x8xf32>, vector<1x8xf32>, vector<1x8xf32> -> vector<1x32xf32>
    %81 = vector.extract_strided_slice %5 {offsets = [0, 16], sizes = [8, 8], strides = [1, 1]} : vector<8x32xf32> to vector<8x8xf32>
    %82 = vector.extract_strided_slice %11 {offsets = [0, 16], sizes = [8, 8], strides = [1, 1]} : vector<8x32xf32> to vector<8x8xf32>
    %83 = vector.extract_strided_slice %18 {offsets = [16, 0], sizes = [8, 8], strides = [1, 1]} : vector<32x8xf32> to vector<8x8xf32>
    %cst_32 = arith.constant dense<0.000000e+00> : vector<8x8xf32>
    %84 = tpu.matmul %81, %82, %cst_32 {dimension_numbers = #tpu.dot_dimension_numbers<[1], [1], [0], [0], [0, 0, 1, 0], [], []>} : vector<8x8xf32>, vector<8x8xf32>, vector<8x8xf32> -> vector<8x8xf32>
    %85 = arith.addf %84, %24 : vector<8x8xf32>
    %cst_33 = arith.constant 0.176776692 : f32
    %86 = vector.broadcast %cst_33 : f32 to vector<8x8xf32>
    %87 = arith.mulf %85, %86 : vector<8x8xf32>
    %cst_34 = arith.constant dense<0xFF800000> : vector<8xf32>
    %88 = vector.multi_reduction <maximumf>, %87, %cst_34 [1] : vector<8x8xf32> to vector<8xf32>
    %89 = vector.shape_cast %88 : vector<8xf32> to vector<8x1xf32>
    %90 = vector.broadcast %89 : vector<8x1xf32> to vector<8x8xf32>
    %91 = arith.subf %87, %90 : vector<8x8xf32>
    %92 = math.exp %91 : vector<8x8xf32>
    %cst_35 = arith.constant dense<0.000000e+00> : vector<8xf32>
    %93 = vector.multi_reduction <add>, %92, %cst_35 [1] : vector<8x8xf32> to vector<8xf32>
    %94 = vector.shape_cast %93 : vector<8xf32> to vector<8x1xf32>
    %95 = tpu.reciprocal %94 : vector<8x1xf32> -> vector<8x1xf32>
    %96 = vector.broadcast %95 : vector<8x1xf32> to vector<8x8xf32>
    %97 = arith.mulf %92, %96 : vector<8x8xf32>
    %cst_36 = arith.constant dense<0.000000e+00> : vector<8x8xf32>
    %98 = tpu.matmul %83, %97, %cst_36 {dimension_numbers = #tpu.dot_dimension_numbers<[1], [1], [0], [0], [0, 0, 1, 0], [], []>} : vector<8x8xf32>, vector<8x8xf32>, vector<8x8xf32> -> vector<8x8xf32>
    %99 = vector.extract_strided_slice %98 {offsets = [0, 0], sizes = [1, 8], strides = [1, 1]} : vector<8x8xf32> to vector<1x8xf32>
    %100 = vector.extract_strided_slice %98 {offsets = [1, 0], sizes = [1, 8], strides = [1, 1]} : vector<8x8xf32> to vector<1x8xf32>
    %101 = vector.extract_strided_slice %98 {offsets = [2, 0], sizes = [1, 8], strides = [1, 1]} : vector<8x8xf32> to vector<1x8xf32>
    %102 = vector.extract_strided_slice %98 {offsets = [3, 0], sizes = [1, 8], strides = [1, 1]} : vector<8x8xf32> to vector<1x8xf32>
    %103 = tpu.concatenate %99, %100, %101, %102 in 1 : vector<1x8xf32>, vector<1x8xf32>, vector<1x8xf32>, vector<1x8xf32> -> vector<1x32xf32>
    %104 = vector.extract_strided_slice %98 {offsets = [4, 0], sizes = [1, 8], strides = [1, 1]} : vector<8x8xf32> to vector<1x8xf32>
    %105 = vector.extract_strided_slice %98 {offsets = [5, 0], sizes = [1, 8], strides = [1, 1]} : vector<8x8xf32> to vector<1x8xf32>
    %106 = vector.extract_strided_slice %98 {offsets = [6, 0], sizes = [1, 8], strides = [1, 1]} : vector<8x8xf32> to vector<1x8xf32>
    %107 = vector.extract_strided_slice %98 {offsets = [7, 0], sizes = [1, 8], strides = [1, 1]} : vector<8x8xf32> to vector<1x8xf32>
    %108 = tpu.concatenate %104, %105, %106, %107 in 1 : vector<1x8xf32>, vector<1x8xf32>, vector<1x8xf32>, vector<1x8xf32> -> vector<1x32xf32>
    %109 = vector.extract_strided_slice %5 {offsets = [0, 24], sizes = [8, 8], strides = [1, 1]} : vector<8x32xf32> to vector<8x8xf32>
    %110 = vector.extract_strided_slice %11 {offsets = [0, 24], sizes = [8, 8], strides = [1, 1]} : vector<8x32xf32> to vector<8x8xf32>
    %111 = vector.extract_strided_slice %18 {offsets = [24, 0], sizes = [8, 8], strides = [1, 1]} : vector<32x8xf32> to vector<8x8xf32>
    %cst_37 = arith.constant dense<0.000000e+00> : vector<8x8xf32>
    %112 = tpu.matmul %109, %110, %cst_37 {dimension_numbers = #tpu.dot_dimension_numbers<[1], [1], [0], [0], [0, 0, 1, 0], [], []>} : vector<8x8xf32>, vector<8x8xf32>, vector<8x8xf32> -> vector<8x8xf32>
    %113 = arith.addf %112, %24 : vector<8x8xf32>
    %cst_38 = arith.constant 0.176776692 : f32
    %114 = vector.broadcast %cst_38 : f32 to vector<8x8xf32>
    %115 = arith.mulf %113, %114 : vector<8x8xf32>
    %cst_39 = arith.constant dense<0xFF800000> : vector<8xf32>
    %116 = vector.multi_reduction <maximumf>, %115, %cst_39 [1] : vector<8x8xf32> to vector<8xf32>
    %117 = vector.shape_cast %116 : vector<8xf32> to vector<8x1xf32>
    %118 = vector.broadcast %117 : vector<8x1xf32> to vector<8x8xf32>
    %119 = arith.subf %115, %118 : vector<8x8xf32>
    %120 = math.exp %119 : vector<8x8xf32>
    %cst_40 = arith.constant dense<0.000000e+00> : vector<8xf32>
    %121 = vector.multi_reduction <add>, %120, %cst_40 [1] : vector<8x8xf32> to vector<8xf32>
    %122 = vector.shape_cast %121 : vector<8xf32> to vector<8x1xf32>
    %123 = tpu.reciprocal %122 : vector<8x1xf32> -> vector<8x1xf32>
    %124 = vector.broadcast %123 : vector<8x1xf32> to vector<8x8xf32>
    %125 = arith.mulf %120, %124 : vector<8x8xf32>
    %cst_41 = arith.constant dense<0.000000e+00> : vector<8x8xf32>
    %126 = tpu.matmul %111, %125, %cst_41 {dimension_numbers = #tpu.dot_dimension_numbers<[1], [1], [0], [0], [0, 0, 1, 0], [], []>} : vector<8x8xf32>, vector<8x8xf32>, vector<8x8xf32> -> vector<8x8xf32>
    %127 = vector.extract_strided_slice %126 {offsets = [0, 0], sizes = [1, 8], strides = [1, 1]} : vector<8x8xf32> to vector<1x8xf32>
    %128 = vector.extract_strided_slice %126 {offsets = [1, 0], sizes = [1, 8], strides = [1, 1]} : vector<8x8xf32> to vector<1x8xf32>
    %129 = vector.extract_strided_slice %126 {offsets = [2, 0], sizes = [1, 8], strides = [1, 1]} : vector<8x8xf32> to vector<1x8xf32>
    %130 = vector.extract_strided_slice %126 {offsets = [3, 0], sizes = [1, 8], strides = [1, 1]} : vector<8x8xf32> to vector<1x8xf32>
    %131 = tpu.concatenate %127, %128, %129, %130 in 1 : vector<1x8xf32>, vector<1x8xf32>, vector<1x8xf32>, vector<1x8xf32> -> vector<1x32xf32>
    %132 = vector.extract_strided_slice %126 {offsets = [4, 0], sizes = [1, 8], strides = [1, 1]} : vector<8x8xf32> to vector<1x8xf32>
    %133 = vector.extract_strided_slice %126 {offsets = [5, 0], sizes = [1, 8], strides = [1, 1]} : vector<8x8xf32> to vector<1x8xf32>
    %134 = vector.extract_strided_slice %126 {offsets = [6, 0], sizes = [1, 8], strides = [1, 1]} : vector<8x8xf32> to vector<1x8xf32>
    %135 = vector.extract_strided_slice %126 {offsets = [7, 0], sizes = [1, 8], strides = [1, 1]} : vector<8x8xf32> to vector<1x8xf32>
    %136 = tpu.concatenate %132, %133, %134, %135 in 1 : vector<1x8xf32>, vector<1x8xf32>, vector<1x8xf32>, vector<1x8xf32> -> vector<1x32xf32>
    %137 = tpu.concatenate %47, %52, %75, %80, %103, %108, %131, %136 in 0 : vector<1x32xf32>, vector<1x32xf32>, vector<1x32xf32>, vector<1x32xf32>, vector<1x32xf32>, vector<1x32xf32>, vector<1x32xf32>, vector<1x32xf32> -> vector<8x32xf32>
    %c0_42 = arith.constant 0 : index
    %c0_43 = arith.constant 0 : index
    %138 = vector.load %arg7[%c0_42, %c0_43] : memref<32x32xf32, #tpu.memory_space<vmem>>, vector<32x32xf32>
    %cst_44 = arith.constant dense<0.000000e+00> : vector<8x32xf32>
    %139 = tpu.matmul %137, %138, %cst_44 {dimension_numbers = #tpu.dot_dimension_numbers<[1], [0], [0], [1], [0, 0, 1, 1], [], []>} : vector<8x32xf32>, vector<32x32xf32>, vector<8x32xf32> -> vector<8x32xf32>
    %c0_45 = arith.constant 0 : index
    %c0_46 = arith.constant 0 : index
    %140 = vector.load %arg11[%c0_45, %c0_46] : memref<1x32xf32, #tpu.memory_space<vmem>>, vector<1x32xf32>
    %141 = vector.broadcast %140 : vector<1x32xf32> to vector<8x32xf32>
    %142 = arith.addf %139, %141 : vector<8x32xf32>
    %c0_47 = arith.constant 0 : index
    %c0_48 = arith.constant 0 : index
    %143 = vector.load %arg12[%c0_47, %c0_48] : memref<8x32xf32, #tpu.memory_space<vmem>>, vector<8x32xf32>
    tpu.vector_store %arg12[%c0_47, %c0_48], %142 {strides = array<i32>} : memref<8x32xf32, #tpu.memory_space<vmem>>, vector<8x32xf32>,
    return
  }
  func.func @transform_0(%arg0: i32) -> (i32, i32) {
    %c0_i32 = arith.constant 0 : i32
    %c0_i32_0 = arith.constant 0 : i32
    return %arg0, %c0_i32 : i32, i32
  }
  func.func @transform_1(%arg0: i32) -> (i32, i32) {
    %c0_i32 = arith.constant 0 : i32
    %c0_i32_0 = arith.constant 0 : i32
    return %arg0, %c0_i32 : i32, i32
  }
  func.func @transform_2(%arg0: i32) -> (i32, i32, i32) {
    %c0_i32 = arith.constant 0 : i32
    %c0_i32_0 = arith.constant 0 : i32
    %c0_i32_1 = arith.constant 0 : i32
    return %arg0, %c0_i32, %c0_i32_0 : i32, i32, i32
  }
  func.func @transform_3(%arg0: i32) -> (i32, i32) {
    %c0_i32 = arith.constant 0 : i32
    %c0_i32_0 = arith.constant 0 : i32
    %c0_i32_1 = arith.constant 0 : i32
    return %c0_i32, %c0_i32_0 : i32, i32
  }
  func.func @transform_4(%arg0: i32) -> (i32, i32) {
    %c0_i32 = arith.constant 0 : i32
    %c0_i32_0 = arith.constant 0 : i32
    %c0_i32_1 = arith.constant 0 : i32
    return %c0_i32, %c0_i32_0 : i32, i32
  }
  func.func @transform_5(%arg0: i32) -> (i32, i32) {
    %c0_i32 = arith.constant 0 : i32
    %c0_i32_0 = arith.constant 0 : i32
    %c0_i32_1 = arith.constant 0 : i32
    return %c0_i32, %c0_i32_0 : i32, i32
  }
  func.func @transform_6(%arg0: i32) -> (i32, i32) {
    %c0_i32 = arith.constant 0 : i32
    %c0_i32_0 = arith.constant 0 : i32
    %c0_i32_1 = arith.constant 0 : i32
    return %c0_i32, %c0_i32_0 : i32, i32
  }
  func.func @transform_7(%arg0: i32) -> (i32, i32) {
    %c0_i32 = arith.constant 0 : i32
    %c0_i32_0 = arith.constant 0 : i32
    %c0_i32_1 = arith.constant 0 : i32
    return %c0_i32, %c0_i32_0 : i32, i32
  }
  func.func @transform_8(%arg0: i32) -> (i32, i32) {
    %c0_i32 = arith.constant 0 : i32
    %c0_i32_0 = arith.constant 0 : i32
    %c0_i32_1 = arith.constant 0 : i32
    return %c0_i32, %c0_i32_0 : i32, i32
  }
  func.func @transform_9(%arg0: i32) -> (i32, i32) {
    %c0_i32 = arith.constant 0 : i32
    %c0_i32_0 = arith.constant 0 : i32
    %c0_i32_1 = arith.constant 0 : i32
    return %c0_i32, %c0_i32_0 : i32, i32
  }
  func.func @transform_10(%arg0: i32) -> (i32, i32) {
    %c0_i32 = arith.constant 0 : i32
    %c0_i32_0 = arith.constant 0 : i32
    %c0_i32_1 = arith.constant 0 : i32
    return %c0_i32, %c0_i32_0 : i32, i32
  }
  func.func @transform_11(%arg0: i32) -> (i32, i32) {
    %c0_i32 = arith.constant 0 : i32
    %c0_i32_0 = arith.constant 0 : i32
    return %arg0, %c0_i32 : i32, i32
  }
}

</mosaic_0001>

<bundles_post_ra>
// kernel: multi_head_attention.1
= control target key start
LH: loop header
LB: loop body
LE: loop exit
PB: predicated region body
PF: predicated region fallthrough
CT: control target
= control target key end

     0   :  { %s1591_s0 = inlined_call_operand.vmem [shape: f32[16,32], index: 0, kind: input, shape index: {}]   ;;  %s1592_s1 = inlined_call_operand.vmem [shape: f32[16,32], index: 1, kind: input, shape index: {}]   ;;  %s1593_s2 = inlined_call_operand.vmem [shape: f32[2,32,8], index: 2, kind: input, shape index: {}]   ;;  %s1594_s3 = inlined_call_operand.vmem [shape: f32[32,32], index: 3, kind: input, shape index: {}]   ;;  %s1595_s4 = inlined_call_operand.vmem [shape: f32[32,32], index: 4, kind: input, shape index: {}]   ;;  %s1596_s5 = inlined_call_operand.vmem [shape: f32[32,32], index: 5, kind: input, shape index: {}]   ;;  %s1597_s6 = inlined_call_operand.vmem [shape: f32[32,32], index: 6, kind: input, shape index: {}]   ;;  %s1598_s7 = inlined_call_operand.vmem [shape: f32[1,32], index: 7, kind: input, shape index: {}]   ;;  %s1599_s8 = inlined_call_operand.vmem [shape: f32[1,32], index: 8, kind: input, shape index: {}]   ;;  %s1600_s9 = inlined_call_operand.vmem [shape: f32[32,1], index: 9, kind: input, shape index: {}]   ;;  %s1601_s10 = inlined_call_operand.vmem [shape: f32[1,32], index: 10, kind: input, shape index: {}]   ;;  %s1602_s11 = inlined_call_operand.hbm [shape: f32[16,32], index: 11, kind: output, shape index: {}]  }
   0x1   :  { %1604 = sst [smem:[#allocation7_spill]] %s1591_s0 }
   0x2   :  { %16 = vsyncpa [#allocation3], 0 }
   0x3   :  { %18 = vsyncpa [#allocation3 + $0x1], 0  ;;  %s1345_s17 = smov 0   ;;  %s1347_s18 = smov 0  }
   0x4   :  { %s1349_s19 = smov 0   ;;  %s1351_s20 = smov 0  }
   0x5 LB: > { %1605 = sst [smem:[#allocation5_spill]] %s1271_s19  ;;  %s1366_s21 = sadd.s32 4294967295, %s1275_s20   ;;  %s1275_s20 = sphi %s1351_s20, %s1614_s20   ;;  %s1271_s19 = sphi %s1349_s19, %s1611_s19   ;;  %s1267_s18 = sphi %s1347_s18, %s1613_s18   ;;  %s1263_s17 = sphi %s1345_s17, %s1612_s17  }
   0x6   : > { %s1107_s22 = sadd.s32 4294967294, %s1275_s20   ;;  %s1370_s23 = sadd.s32 1, %s1275_s20  }
   0x7   : > { %s277_s24 = sadd.s32 1, %s1271_s19  ;;  %s274_s25 = ssub.s32 %s1275_s20, %s1370_s23 }
   0x8   : > { %p287_p0 = scmp.ne.s32.totalorder %s1271_s19, %s1267_s18  ;;  %p275_p1 = scmp.eq.s32.totalorder %s274_s25, 0 }
   0x9   : > { %p288_p2 = scmp.eq.s32.totalorder %s1366_s21, 1  ;;  %p293_p3 = scmp.ne.s32.totalorder %s1267_s18, %s1263_s17 }
   0xa   : > { %p294_p4 = scmp.eq.s32.totalorder %s1107_s22, 1  ;;  %p1110_p7 = scmp.ge.s32.totalorder %s1275_s20, 1 }
   0xb   : > { %s1381_s26 = scalar_select %p275_p1, %s1271_s19, %s277_s24  }
   0xc   : > { %p1383_p5 = por %p288_p2, %p287_p0  ;;  %p1387_p6 = por %p294_p4, %p293_p3 }
   0xd   : > { %1606 = sst [smem:[#allocation6_spill]] %s1381_s26  ;;  %p358_p8 = scmp.lt.s32.totalorder %s1275_s20, 3 }
   0xf   : > { %p359_p9 = pnand %p1110_p7, %p358_p8 }
  0x10   : > { %p406_p10 = scmp.lt.s32.totalorder (!%p359_p9), %s1366_s21, 1  ;;  %s1609_s0 = sld [smem:[#allocation7_spill]] (!%p359_p9) }
  0x11   : > { %362 = sbr.rel (%p359_p9) target bundleno = 1470 (0x5be), region = 64  ;;  %s1279_s26 = smov (!%p359_p9), 120  }
  0x12   : > { %s1280_s25 = smov (!%p359_p9), 104   ;;  %s1282_s13 = smov (!%p359_p9), 16  }
  0x13   : > { %s1284_s16 = smov (!%p359_p9), 24  }
  0x16   : > { %v456_v0 = vld [vmem:[%s1595_s4 + $0x18] sm:$0xff]  ;;  %v455_v1 = vld [vmem:[%s1595_s4 + $0x10] sm:$0xff]  ;;  %v454_v4 = vld [vmem:[%s1595_s4 + $0x8] sm:$0xff]  ;;  %s1413_s12 = scalar_select %p406_p10, %s1366_s21, 1  ;;  %vm428_vm0 = vcmask 261120   ;;  %v1277_v10 = vmov 0   ;;  %v557_v20 = vlaneseq }
  0x17   : > { %v423_v2 = vld [vmem:[%s1594_s3 + $0x18] sm:$0xff]  ;;  %476 = vmatpush.msra.mxu1 %v456_v0  ;;  %v422_v3 = vld [vmem:[%s1594_s3 + $0x10] sm:$0xff]  ;;  %v421_v5 = vld [vmem:[%s1594_s3 + $0x8] sm:$0xff]  ;;  %1191 = vset.pattern.permute.xlu0 %v1277_v10  ;;  %vm563_vm1 = vcmask 64512   ;;  %v1281_v23 = vmov 0.0  }
  0x18   : > { %444 = vmatpush.msra.mxu0 %v423_v2  ;;  %v453_v6 = vld [vmem:[%s1595_s4] sm:$0xff]  ;;  %s1112_s15 = sshll.u32 %s1413_s12, 3  ;;  %1192 = vset.pattern.permute.xlu1 %v1277_v10  ;;  %v558_v21 = vshrl.u32 %v557_v20, 7  ;;  %v560_v22 = vand.u32 127, %v557_v20  ;;  %v485_v43 = vld [vmem:[%s1596_s5 + $0x8] sm:$0xff] }
  0x19   : > { %477 = vmatpush.msra.mxu1 %v455_v1  ;;  %v420_v7 = vld [vmem:[%s1594_s3] sm:$0xff]  ;;  %s413_s29 = scalar_lea.vmem %s1592_s1, %s1112_s15  ;;  %s409_s19 = scalar_lea.vmem %s1609_s0, %s1112_s15  ;;  %1193 = vset.pattern.permute.xlu2 %v1277_v10  ;;  %v493_v44 = vld [vmem:[%s1600_s9 + $0x8] sm:$0xff] }
  0x1a   : > { %445 = vmatpush.msra.mxu0 %v422_v3  ;;  %v452_v8 = vld [vmem:[%s413_s29] sm:$0xff]  ;;  %vm561_vm2 = vcmp.gt.s32.totalorder %v560_v22, %v558_v21  ;;  %s1143_s29 = sshll.u32 %s1413_s12, 5 }
  0x1b   : > { %478 = vmatpush.msra.mxu1 %v454_v4  ;;  %v419_v9 = vld [vmem:[%s409_s19] sm:$0xff]  ;;  %s1278_s19 = smov 112   ;;  %v1449_v24 = vsel %vm561_vm2, -1e+09, %v1281_v23  ;;  %s418_s14 = scalar_lea.vmem %s1593_s2, %s1143_s29 }
  0x1c   : > { %446 = vmatpush.msra.mxu0 %v421_v5  ;;  %v1194_v11 = vld [vmem:[%s1599_s8] ss:$0 sm:$0xff]  ;;  %v491_v29 = vld [vmem:[%s418_s14 + $0x18] sm:$0xff]  ;;  %v490_v30 = vld [vmem:[%s418_s14 + $0x10] sm:$0xff] }
  0x1d   : > { %479 = vmatpush.msra.mxu1 %v453_v6  ;;  %v1195_v12 = vld [vmem:[%s1598_s7] ss:$0 sm:$0xff]  ;;  %540 = vmatpush.msra.mxu2 %v491_v29  ;;  %v489_v31 = vld [vmem:[%s418_s14 + $0x8] sm:$0xff] }
  0x1e   : > { %447 = vmatpush.msra.mxu0 %v420_v7  ;;  %1117 = vmatmul.msk.f32.vlgmr.msra.gmra.mxu1 %vm428_vm0, %v452_v8  ;;  %v492_v17 = vld [vmem:[%s1600_s9] sm:$0xff] }
  0x1f   : > { %1116 = vmatmul.msk.f32.vlgmr.msra.gmra.mxu0 %vm428_vm0, %v419_v9  ;;  %541 = vmatpush.msra.mxu2 %v490_v30  ;;  %v488_v32 = vld [vmem:[%s418_s14] sm:$0xff]  ;;  %s1283_s14 = smov 8  }
  0x20   : > { %v484_v33 = vld [vmem:[%s1596_s5] sm:$0xff] }
  0x21   : > { %542 = vmatpush.msra.mxu2 %v489_v31 }
  0x23   : > { %543 = vmatpush.msra.mxu2 %v488_v32 }
  0x24   : > { %1118 = vmatmul.msk.f32.vlgmr.msra.gmra.mxu2 %vm428_vm0, %v484_v33 }
  0x2c   : > { %1119 = vmatmul.msk.f32.gmra.mxu2 %vm428_vm0, %v485_v43 }
  0x9b   : > { %v481_v13 = vpop.f32.mrf.mxu1 }
  0x9c   : > { %v449_v14 = vpop.f32.mrf.mxu0  ;;  %v482_v15 = vadd.f32 %v1194_v11, %v481_v13 }
  0x9d   : > { %v1436_v16 = vadd.f32 %v1195_v12, %v449_v14 }
  0x9e   : > { %756 = vrot.lane.b32.xlu2 %v482_v15, %s1278_s19  ;;  %661 = vrot.lane.b32.xlu0 %v482_v15, %s1279_s26 }
  0x9f   : > { %1122 = vmatpush.xpose.msk.msra.mxu3 %vm563_vm1, %v482_v15 }
  0xa2   : > { %1123 = vmatmul.msk.f32.vlgmr.msra.gmra.mxu3 %vm563_vm1, %v1436_v16 }
  0xa6   : > { %659 = vrot.lane.b32.xlu0 %v1436_v16, %s1279_s26 }
  0xa7   : > { %v545_v61 = vpop.f32.mrf.mxu2 }
  0xae   : > { %498 = vperm.xlu0 %1191, %v492_v17  }
  0xaf   : > { %v548_v13 = vpop.f32.mrf.mxu2 }
  0xb6   : > { %851 = vrot.lane.b32.xlu0 %v482_v15, %s1280_s25 }
  0xbe   : > { %754 = vrot.lane.b32.xlu0 %v1436_v16, %s1278_s19  ;;  %s1140_s19 = sshll.u32 %s1366_s21, 3 }
  0xbf   : > { %s1019_s24 = scalar_lea.hbm %s1602_s11, %s1140_s19 }
  0xf8   : > { %v757_v48 = vpop.permute.xlu2 %756 }
 0x110   : > { %v662_v18 = vpop.permute.xlu0 %661 }
 0x111   : > { %1126 = vmatpush.xpose.msk.msrb.mxu0 %vm563_vm1, %v662_v18 }
 0x118   : > { %v660_v19 = vpop.permute.xlu0 %659 }
 0x119   : > { %1127 = vmatmul.msk.f32.vlgmr.msrb.gmra.mxu0 %vm563_vm1, %v660_v19  ;;  %v486_v19 = vld [vmem:[%s1596_s5 + $0x10] sm:$0xff] }
 0x11a   : > { %1120 = vmatmul.msk.f32.gmra.mxu2 %vm428_vm0, %v486_v19 }
 0x120   : > { %v499_v54 = vpop.permute.xlu0 %498 }
 0x121   : > { %v546_v1 = vadd.f32 %v545_v61, %v499_v54  ;;  %v495_v54 = vld [vmem:[%s1600_s9 + $0x18] sm:$0xff] }
 0x125   : > { %v587_v25 = vpop.f32.mrf.mxu3 }
 0x126   : > { %v588_v26 = vadd.f32 %v587_v25, %v1449_v24 }
 0x128   : > { %v590_v27 = vmul.f32 0.17677669, %v588_v26  ;;  %v852_v2 = vpop.permute.xlu0 %851 }
 0x12a   : > { %v591_v28 = vsel %vm563_vm1, %v590_v27, -inf }
 0x12b   : > { %592 = vmax.xlane.f32.xlu1 %v591_v28 }
 0x130   : > { %v755_v3 = vpop.permute.xlu0 %754 }
 0x196   : > { %v684_v34 = vpop.f32.mrf.mxu0 }
 0x197   : > { %v685_v35 = vadd.f32 %v684_v34, %v1449_v24 }
 0x199   : > { %v687_v36 = vmul.f32 0.17677669, %v685_v35 }
 0x19b   : > { %v688_v37 = vsel %vm563_vm1, %v687_v36, -inf }
 0x19c   : > { %689 = vmax.xlane.f32.xlu1 %v688_v37 }
 0x19e   : > { %v593_v38 = vpop.xlane.xlu1 %592 }
 0x19f   : > { %v594_v39 = vsub.f32 %v590_v27, %v593_v38  ;;  %v494_v27 = vld [vmem:[%s1600_s9 + $0x10] sm:$0xff] }
 0x1a1   : > { %v595_v40 = vmul.f32 1.442695, %v594_v39 }
 0x1a3   : > { %1197 = vpow2.f32 %v595_v40 }
 0x1a9   : > { %v1198_v41 = vpop.eup %1197 }
 0x1aa   : > { %v597_v42 = vsel %vm563_vm1, %v1198_v41, 0.0 }
 0x1ab   : > { %598 = vadd.xlane.f32.xlu2 %v597_v42 }
 0x1b5   : > { %503 = vperm.xlu1 %1192, %v493_v44  }
 0x20f   : > { %v690_v45 = vpop.xlane.xlu1 %689 }
 0x210   : > { %v691_v46 = vsub.f32 %v687_v36, %v690_v45 }
 0x212   : > { %v692_v47 = vmul.f32 1.442695, %v691_v46 }
 0x214   : > { %1199 = vpow2.f32 %v692_v47 }
 0x21a   : > { %v1200_v49 = vpop.eup %1199 }
 0x21b   : > { %v694_v50 = vsel %vm563_vm1, %v1200_v49, 0.0 }
 0x21c   : > { %695 = vadd.xlane.f32.xlu2 %v694_v50 }
 0x21e   : > { %v599_v51 = vpop.xlane.xlu2 %598 }
 0x21f   : > { %1201 = vrcp.f32 %v599_v51  ;;  %v611_v56 = vand.u32 2147483648, %v599_v51  ;;  %v609_v58 = vand.u32 2147483647, %v599_v51  ;;  %vm605_vm4 = vweird.f32 %v599_v51 }
 0x221   : > { %v612_v60 = vor.u32 1.1754944e-38, %v611_v56  ;;  %vm610_vm6 = vcmp.eq.f32.partialorder %v609_v58, 8.507059e+37 }
 0x225   : > { %v1202_v52 = vpop.eup %1201 }
 0x226   : > { %v601_v53 = vmul.f32 %v1202_v52, %v599_v51  ;;  %vm606_vm3 = vweird.f32 %v1202_v52 }
 0x227   : > { %vm607_vm5 = vmor %vm605_vm4, %vm606_vm3  ;;  %v504_v15 = vpop.permute.xlu1 %503 }
 0x228   : > { %v602_v55 = vsub.f32 1.0, %v601_v53  ;;  %v549_v18 = vadd.f32 %v548_v13, %v504_v15 }
 0x22a   : > { %v603_v57 = vmul.f32 %v1202_v52, %v602_v55 }
 0x22c   : > { %v604_v59 = vadd.f32 %v1202_v52, %v603_v57 }
 0x22e   : > { %v608_v62 = vsel %vm607_vm5, %v1202_v52, %v604_v59  ;;  %v551_v59 = vpop.f32.mrf.mxu2  ;;  %vm655_vm5 = vcmask 130048  }
 0x22f   : > { %v613_v63 = vsel %vm610_vm6, %v612_v60, %v608_v62  ;;  %vm657_vm6 = vcmask 195584  }
 0x230   : > { %v614_v0 = vmul.f32 %v1198_v41, %v613_v63 }
 0x232   : > { %1124 = vmatpush.xpose.msk.msrb.mxu3 %vm563_vm1, %v614_v0 }
 0x234   : > { %849 = vrot.lane.b32.xlu2 %v1436_v16, %s1280_s25 }
 0x235   : > { %1125 = vmatmul.msk.f32.vlgmr.msrb.gmra.mxu3 %vm563_vm1, %v546_v1 }
 0x236   : > { %1130 = vmatpush.xpose.msk.msra.mxu3 %vm563_vm1, %v757_v48 }
 0x23d   : > { %1131 = vmatmul.msk.f32.vlgmr.msra.gmra.mxu3 %vm563_vm1, %v755_v3 }
 0x28f   : > { %v696_v4 = vpop.xlane.xlu2 %695 }
 0x290   : > { %1203 = vrcp.f32 %v696_v4  ;;  %v708_v8 = vand.u32 2147483648, %v696_v4  ;;  %v706_v10 = vand.u32 2147483647, %v696_v4  ;;  %vm702_vm8 = vweird.f32 %v696_v4 }
 0x292   : > { %v709_v12 = vor.u32 1.1754944e-38, %v708_v8  ;;  %vm707_vm10 = vcmp.eq.f32.partialorder %v706_v10, 8.507059e+37 }
 0x296   : > { %v1204_v5 = vpop.eup %1203 }
 0x297   : > { %v698_v6 = vmul.f32 %v1204_v5, %v696_v4  ;;  %vm703_vm7 = vweird.f32 %v1204_v5  ;;  %v850_v20 = vpop.permute.xlu2 %849 }
 0x298   : > { %vm704_vm9 = vmor %vm702_vm8, %vm703_vm7  ;;  %vm962_vm7 = vcmask 1040384   ;;  %vm964_vm8 = vcmask 1041408  }
 0x299   : > { %v699_v7 = vsub.f32 1.0, %v698_v6 }
 0x29b   : > { %v700_v9 = vmul.f32 %v1204_v5, %v699_v7 }
 0x29d   : > { %v701_v11 = vadd.f32 %v1204_v5, %v700_v9 }
 0x29f   : > { %v705_v14 = vsel %vm704_vm9, %v1204_v5, %v701_v11  ;;  %vm966_vm9 = vcmask 1042432  }
 0x2a0   : > { %v710_v16 = vsel %vm707_vm10, %v709_v12, %v705_v14  ;;  %vm968_vm10 = vcmask 1043456  }
 0x2a1   : > { %v711_v17 = vmul.f32 %v1200_v49, %v710_v16 }
 0x2a3   : > { %1128 = vmatpush.xpose.msk.msrb.mxu1 %vm563_vm1, %v711_v17 }
 0x2a6   : > { %1129 = vmatmul.msk.f32.vlgmr.msrb.gmra.mxu1 %vm563_vm1, %v549_v18 }
 0x2a7   : > { %1134 = vmatpush.xpose.msk.msra.mxu1 %vm563_vm1, %v852_v2 }
 0x2ae   : > { %1135 = vmatmul.msk.f32.vlgmr.msra.gmra.mxu1 %vm563_vm1, %v850_v20 }
 0x2b8   : > { %v1486_v21 = vpop.f32.mrf.mxu3 }
 0x2b9   : > { %v646_v28 = vrot.slane %v1486_v21, 2  ;;  %v642_v40 = vrot.slane %v1486_v21, 1  ;;  %v650_v41 = vrot.slane %v1486_v21, 3 }
 0x2c0   : > { %v779_v22 = vpop.f32.mrf.mxu3 }
 0x2c1   : > { %v780_v23 = vadd.f32 %v779_v22, %v1449_v24 }
 0x2c3   : > { %v782_v25 = vmul.f32 0.17677669, %v780_v23 }
 0x2c5   : > { %v783_v26 = vsel %vm563_vm1, %v782_v25, -inf }
 0x2c6   : > { %784 = vmax.xlane.f32.xlu0 %v783_v26 }
 0x2da   : > { %508 = vperm.xlu0 %1191, %v494_v27   ;;  %v979_v27 = vld [vmem:[%s1597_s6 + $0x18] sm:$0xff] }
 0x2e2   : > { %647 = vrot.lane.b32.xlu0 %v646_v28, %s1282_s13 }
 0x323   : > { %v1495_v29 = vpop.f32.mrf.mxu1 }
 0x324   : > { %v743_v30 = vrot.slane %v1495_v29, 2  ;;  %v739_v63 = vrot.slane %v1495_v29, 1  ;;  %v747_v0 = vrot.slane %v1495_v29, 3 }
 0x326   : > { %744 = vrot.lane.b32.xlu0 %v743_v30, %s1282_s13  ;;  %v978_v30 = vld [vmem:[%s1597_s6 + $0x10] sm:$0xff] }
 0x32b   : > { %v874_v31 = vpop.f32.mrf.mxu1 }
 0x32c   : > { %v875_v32 = vadd.f32 %v874_v31, %v1449_v24  ;;  %v487_v24 = vld [vmem:[%s1596_s5 + $0x18] sm:$0xff]  ;;  %v977_v31 = vld [vmem:[%s1597_s6 + $0x8] sm:$0xff] }
 0x32d   : > { %1121 = vmatmul.msk.f32.gmra.mxu2 %vm428_vm0, %v487_v24 }
 0x32e   : > { %v877_v33 = vmul.f32 0.17677669, %v875_v32  ;;  %v976_v32 = vld [vmem:[%s1597_s6] sm:$0xff] }
 0x330   : > { %v878_v34 = vsel %vm563_vm1, %v877_v33, -inf }
 0x331   : > { %879 = vmax.xlane.f32.xlu1 %v878_v34 }
 0x339   : > { %v785_v35 = vpop.xlane.xlu0 %784 }
 0x33a   : > { %v786_v36 = vsub.f32 %v782_v25, %v785_v35 }
 0x33c   : > { %v787_v37 = vmul.f32 1.442695, %v786_v36 }
 0x33e   : > { %1205 = vpow2.f32 %v787_v37 }
 0x344   : > { %v1206_v38 = vpop.eup %1205 }
 0x345   : > { %v789_v39 = vsel %vm563_vm1, %v1206_v38, 0.0 }
 0x346   : > { %790 = vadd.xlane.f32.xlu1 %v789_v39 }
 0x34c   : > { %v509_v60 = vpop.permute.xlu0 %508 }
 0x34d   : > { %v552_v62 = vadd.f32 %v551_v59, %v509_v60 }
 0x354   : > { %v648_v28 = vpop.permute.xlu0 %647 }
 0x35f   : > { %643 = vrot.lane.b32.xlu1 %v642_v40, %s1283_s14 }
 0x367   : > { %651 = vrot.lane.b32.xlu1 %v650_v41, %s1284_s16 }
 0x398   : > { %v745_v35 = vpop.permute.xlu0 %744 }
 0x3a4   : > { %v880_v42 = vpop.xlane.xlu1 %879 }
 0x3a5   : > { %v881_v43 = vsub.f32 %v877_v33, %v880_v42 }
 0x3a7   : > { %v882_v44 = vmul.f32 1.442695, %v881_v43 }
 0x3a9   : > { %1207 = vpow2.f32 %v882_v44 }
 0x3af   : > { %v1208_v45 = vpop.eup %1207 }
 0x3b0   : > { %v884_v46 = vsel %vm563_vm1, %v1208_v45, 0.0  ;;  %v554_v11 = vpop.f32.mrf.mxu2 }
 0x3b1   : > { %885 = vadd.xlane.f32.xlu2 %v884_v46 }
 0x3b9   : > { %v791_v47 = vpop.xlane.xlu1 %790 }
 0x3ba   : > { %1209 = vrcp.f32 %v791_v47  ;;  %v803_v51 = vand.u32 2147483648, %v791_v47  ;;  %v801_v53 = vand.u32 2147483647, %v791_v47  ;;  %vm797_vm12 = vweird.f32 %v791_v47 }
 0x3bc   : > { %v804_v56 = vor.u32 1.1754944e-38, %v803_v51  ;;  %vm802_vm14 = vcmp.eq.f32.partialorder %v801_v53, 8.507059e+37 }
 0x3c0   : > { %v1210_v48 = vpop.eup %1209 }
 0x3c1   : > { %v793_v49 = vmul.f32 %v1210_v48, %v791_v47  ;;  %vm798_vm11 = vweird.f32 %v1210_v48 }
 0x3c2   : > { %vm799_vm13 = vmor %vm797_vm12, %vm798_vm11  ;;  %vm970_vm11 = vcmask 1044480   ;;  %vm972_vm12 = vcmask 1045504  }
 0x3c3   : > { %v794_v50 = vsub.f32 1.0, %v793_v49 }
 0x3c5   : > { %v795_v52 = vmul.f32 %v1210_v48, %v794_v50 }
 0x3c7   : > { %v796_v55 = vadd.f32 %v1210_v48, %v795_v52 }
 0x3c9   : > { %v800_v57 = vsel %vm799_vm13, %v1210_v48, %v796_v55  ;;  %513 = vperm.xlu2 %1193, %v495_v54   ;;  %vm974_vm13 = vcmask 1046528  }
 0x3ca   : > { %v805_v58 = vsel %vm802_vm14, %v804_v56, %v800_v57 }
 0x3cb   : > { %v806_v61 = vmul.f32 %v1206_v38, %v805_v58 }
 0x3cd   : > { %1132 = vmatpush.xpose.msk.msra.mxu0 %vm563_vm1, %v806_v61 }
 0x3d0   : > { %1133 = vmatmul.msk.f32.vlgmr.msra.gmra.mxu0 %vm563_vm1, %v552_v62 }
 0x3d1   : > { %740 = vrot.lane.b32.xlu2 %v739_v63, %s1283_s14  ;;  %v644_v26 = vpop.permute.xlu1 %643  ;;  %999 = vmatpush.msrb.mxu0 %v979_v27 }
 0x3d2   : > { %v654_v36 = vsel %vm563_vm1, %v1486_v21, %v644_v26 }
 0x3d3   : > { %1000 = vmatpush.msrb.mxu0 %v978_v30  ;;  %v656_v40 = vsel %vm655_vm5, %v654_v36, %v648_v28 }
 0x3d5   : > { %1001 = vmatpush.msrb.mxu0 %v977_v31 }
 0x3d7   : > { %1002 = vmatpush.msrb.mxu0 %v976_v32 }
 0x3d9   : > { %748 = vrot.lane.b32.xlu2 %v747_v0, %s1284_s16  ;;  %v652_v34 = vpop.permute.xlu1 %651 }
 0x3da   : > { %v658_v42 = vsel %vm657_vm6, %v656_v40, %v652_v34 }
 0x424   : > { %v886_v1 = vpop.xlane.xlu2 %885 }
 0x425   : > { %1211 = vrcp.f32 %v886_v1  ;;  %v898_v5 = vand.u32 2147483648, %v886_v1  ;;  %v896_v7 = vand.u32 2147483647, %v886_v1  ;;  %vm892_vm2 = vweird.f32 %v886_v1 }
 0x427   : > { %v899_v9 = vor.u32 1.1754944e-38, %v898_v5  ;;  %vm897_vm4 = vcmp.eq.f32.partialorder %v896_v7, 8.507059e+37 }
 0x42b   : > { %v1212_v2 = vpop.eup %1211 }
 0x42c   : > { %v888_v3 = vmul.f32 %v1212_v2, %v886_v1  ;;  %vm893_vm15 = vweird.f32 %v1212_v2  ;;  %v514_v13 = vpop.permute.xlu2 %513 }
 0x42d   : > { %vm894_vm3 = vmor %vm892_vm2, %vm893_vm15  ;;  %v555_v15 = vadd.f32 %v554_v11, %v514_v13 }
 0x42e   : > { %v889_v4 = vsub.f32 1.0, %v888_v3 }
 0x430   : > { %v890_v6 = vmul.f32 %v1212_v2, %v889_v4 }
 0x432   : > { %v891_v8 = vadd.f32 %v1212_v2, %v890_v6 }
 0x434   : > { %v895_v10 = vsel %vm894_vm3, %v1212_v2, %v891_v8  ;;  %v741_v33 = vpop.permute.xlu2 %740  ;;  %v1196_v2 = vld [vmem:[%s1601_s10] ss:$0 sm:$0xff] }
 0x435   : > { %v900_v12 = vsel %vm897_vm4, %v899_v9, %v895_v10  ;;  %v751_v39 = vsel %vm563_vm1, %v1495_v29, %v741_v33 }
 0x436   : > { %v901_v14 = vmul.f32 %v1208_v45, %v900_v12  ;;  %v752_v43 = vsel %vm655_vm5, %v751_v39, %v745_v35  ;;  %v945_v45 = vrot.slane %v658_v42, 3 }
 0x438   : > { %1136 = vmatpush.xpose.msk.msrb.mxu3 %vm563_vm1, %v901_v14  ;;  %v963_v48 = vsel %vm962_vm7, %v658_v42, %v945_v45 }
 0x43b   : > { %1137 = vmatmul.msk.f32.vlgmr.msrb.gmra.mxu3 %vm563_vm1, %v555_v15 }
 0x43c   : > { %v749_v37 = vpop.permute.xlu2 %748 }
 0x43d   : > { %v753_v44 = vsel %vm657_vm6, %v752_v43, %v749_v37 }
 0x43e   : > { %v948_v46 = vrot.slane %v753_v44, 6  ;;  %v950_v49 = vrot.slane %v753_v44, 1 }
 0x440   : > { %v965_v50 = vsel %vm964_vm8, %v963_v48, %v948_v46 }
 0x441   : > { %v967_v54 = vsel %vm966_vm9, %v965_v50, %v950_v49 }
 0x44d   : > { %v830_v16 = vpop.f32.mrf.mxu0 }
 0x44e   : > { %v834_v17 = vrot.slane %v830_v16, 1  ;;  %v838_v18 = vrot.slane %v830_v16, 2  ;;  %v842_v19 = vrot.slane %v830_v16, 3 }
 0x450   : > { %835 = vrot.lane.b32.xlu1 %v834_v17, %s1283_s14  ;;  %839 = vrot.lane.b32.xlu0 %v838_v18, %s1282_s13 }
 0x451   : > { %843 = vrot.lane.b32.xlu2 %v842_v19, %s1284_s16 }
 0x4ab   : > { %v844_v47 = vpop.permute.xlu2 %843 }
 0x4be   : > { %v925_v20 = vpop.f32.mrf.mxu3 }
 0x4bf   : > { %v929_v22 = vrot.slane %v925_v20, 1  ;;  %v933_v23 = vrot.slane %v925_v20, 2  ;;  %v937_v25 = vrot.slane %v925_v20, 3 }
 0x4c1   : > { %930 = vrot.lane.b32.xlu1 %v929_v22, %s1283_s14  ;;  %934 = vrot.lane.b32.xlu0 %v933_v23, %s1282_s13  ;;  %s1023_s14 = sshll.u32 %s1019_s24, 4  ;;  %s1024_s14 = int_to_ptr.hbm [resolvable:$true] %s1023_s14 }
 0x4c2   : > { %938 = vrot.lane.b32.xlu2 %v937_v25, %s1284_s16  ;;  %v836_v38 = vpop.permute.xlu1 %835  ;;  %v840_v24 = vpop.permute.xlu0 %839  ;;  %s403_s16 = sand.u32 1, %s1267_s18   ;;  %s1227_s21 = sshra.s32 %s1024_s14, 4  ;;  %s1228_s21 = int_to_ptr.hbm [resolvable:$true] %s1227_s21 }
 0x4c3   : > { %v846_v41 = vsel %vm563_vm1, %v830_v16, %v836_v38  ;;  %s1111_s12 = sshll.u32 %s403_s16, 3  ;;  %s1009_s13 = scalar_lea.sflag [#allocation3], %s403_s16 }
 0x4c4   : > { %v847_v21 = vsel %vm655_vm5, %v846_v41, %v840_v24  ;;  %s405_s30 = scalar_lea.vmem [#allocation2], %s1111_s12  ;;  %s1229_s0 = scalar_lea.hbm %s1228_s21, 8 }
 0x4c5   : > { %v848_v29 = vsel %vm657_vm6, %v847_v21, %v844_v47  ;;  %s1021_s22 = sshll.u32 %s405_s30, 4  ;;  %p1230_p11 = scmp.ne.s32.totalorder %s1228_s21, %s1229_s0  ;;  %s1022_s22 = int_to_ptr.vmem [resolvable:$true] %s1021_s22 }
 0x4c6   : > { %v953_v51 = vrot.slane %v848_v29, 4  ;;  %v955_v55 = vrot.slane %v848_v29, 7  ;;  %s1233_s12 = scalar_lea.hbm %s1602_s11, 16  ;;  %p1234_p0 = scmp.lt.s32.totalorder %s1228_s21, %s1602_s11 }
 0x4c7   : > { %p1231_p12 = pnand %p1230_p11, %p1383_p5  ;;  %p1235_p1 = scmp.lt.s32.totalorder %s1233_s12, %s1229_s0 }
 0x4c8   : > { %v969_v57 = vsel %vm968_vm10, %v967_v54, %v953_v51 }
 0x4c9   : > { %v971_v63 = vsel %vm970_vm11, %v969_v57, %v955_v55  ;;  %p1232_p13 = pneg %p1231_p12  ;;  %p1236_p2 = por %p1235_p1, %p1234_p0 }
 0x4cb   : > { %p1237_p3 = pnand %p1236_p2, %p1232_p13 }
 0x51c   : > { %v939_v58 = vpop.permute.xlu2 %938 }
 0x533   : > { %v931_v52 = vpop.permute.xlu1 %930  ;;  %v935_v53 = vpop.permute.xlu0 %934 }
 0x534   : > { %v941_v56 = vsel %vm563_vm1, %v925_v20, %v931_v52 }
 0x535   : > { %v942_v59 = vsel %vm655_vm5, %v941_v56, %v935_v53 }
 0x536   : > { %v943_v60 = vsel %vm657_vm6, %v942_v59, %v939_v58 }
 0x537   : > { %v958_v61 = vrot.slane %v943_v60, 2  ;;  %v960_v62 = vrot.slane %v943_v60, 5 }
 0x539   : > { %v973_v0 = vsel %vm972_vm12, %v971_v63, %v958_v61 }
 0x53a   : > { %v975_v1 = vsel %vm974_vm13, %v973_v0, %v960_v62 }
 0x53b   : > { %1138 = vmatmul.msk.f32.vlgmr.msrb.gmra.mxu0 %vm428_vm0, %v975_v1 }
 0x5b8   : > { %v1004_v3 = vpop.f32.mrf.mxu0 }
 0x5b9   : > { %v1005_v4 = vadd.f32 %v1196_v2, %v1004_v3 }
 0x5bb   : > { %1007 = vst.msk [vmem:[%s405_s30] sm:$0xff] %vm428_vm0, %v1005_v4 }
 0x5bc   : > { %1240 = shalt.err (!%p1237_p3)
}
 0x5bd   : > { %1144 = dma.vmem_to_hbm [thread:$0]  (%p1383_p5), %s1022_s22, 128, %s1024_s14, %s1009_s13  }
 0x5be PF: > { %p1150_p4 = scmp.ge.s32.totalorder %s1275_s20, 2  ;;  %s1035_s16 = sand.u32 1, %s1263_s17  }
 0x5bf   : > { %s1036_s25 = scalar_lea.sflag [#allocation3], %s1035_s16 }
 0x5c0   : > { %p1147_p7 = pnand %p1150_p4, %p1387_p6 }
 0x5c2   : > { %p1148_p8 = pneg %p1147_p7 }
 0x5c4   : > { %1258 = dma.done.wait (%p1148_p8), %s1036_s25, 128  }
 0x5c5   : > { %1260 = vsyncadd (%p1148_p8), %s1036_s25, 4294967168  ;;  %s1610_s0 = sld [smem:[#allocation5_spill]]  ;;  %p21_p9 = scmp.ge.s32.totalorder %s1370_s23, 4  }
 0x5c6   : > { %s1611_s19 = sld [smem:[#allocation6_spill]]  ;;  %s1612_s17 = smov %s1267_s18 }
 0x5c7   : > { %s1614_s20 = smov %s1370_s23  ;;  %23 = sbr.rel (!%p21_p9) target bundleno = 5 (0x5), region = 105 }
 0x5cb   : > { %s1613_s18 = smov %s1610_s0 }
 0x5cc   :  { %1042 = vsyncpa [#allocation3], 1 }
 0x5cd   :  { %1044 = vsyncpa [#allocation3 + $0x1], 1 }

</bundles_post_ra>
